<compile_context>
chip_gen: v5e
topology: v5e:2x2
jax: 0.10.0
libtpu: 0.0.40
codegen_flags: <defaults>
</compile_context>

<pallas_src>
import functools

import jax
import jax.numpy as jnp
from jax.experimental import pallas as pl
from jax.experimental.pallas import tpu as pltpu


# --------------------------------------------------------------------------- #
# Kernel
# --------------------------------------------------------------------------- #
def _pathcnn_kernel(x_ref, w_ref, b_ref, o_ref, xpad_ref, *, padding):
    """One batch block of Conv1d + Swish + MaxPool1d(2).

    x_ref    : (B_blk, L, C_in)        input block (stored dtype, unpadded)
    w_ref    : (K, C_in, C_out)        tap-major conv weights (compute dtype)
    b_ref    : (1, C_out)              conv bias (f32)
    o_ref    : (B_blk, L_out, C_out)   pooled output block
    xpad_ref : (B_blk, L + 2p, C_in)   VMEM scratch: zero-padded input copy
    """
    B_blk, L, C_in = x_ref.shape
    K = w_ref.shape[0]
    _, L_out, C_out = o_ref.shape
    cdt = xpad_ref.dtype

    # ---- Stage the input block into the padded scratch (cast happens in
    #      VMEM); only the 2*padding halo rows get zeroed. -------------------
    xpad_ref[:, padding:padding + L, :] = x_ref[...].astype(cdt)
    if padding > 0:
        halo = jnp.zeros((B_blk, padding, C_in), cdt)
        xpad_ref[:, 0:padding, :] = halo
        xpad_ref[:, padding + L:padding + L + padding, :] = halo

    # ---- Conv1d fused with MaxPool1d(2):
    #      conv[l]      = sum_k W_k . xpad[l + k]
    #      out[p]       = max(swish(conv[2p] + b), swish(conv[2p+1] + b))
    # Even / odd conv rows are accumulated separately (strided reads of the
    # padded scratch), so no full-length activation buffer is ever stored. ---
    rows = B_blk * L_out
    acc_e = jnp.zeros((rows, C_out), jnp.float32)
    acc_o = jnp.zeros((rows, C_out), jnp.float32)
    for k in range(K):                                   # K is small & static
        w_k = w_ref[k]                                   # (C_in, C_out)
        xe = xpad_ref[:, pl.ds(k, L_out, 2), :].reshape(rows, C_in)
        xo = xpad_ref[:, pl.ds(k + 1, L_out, 2), :].reshape(rows, C_in)
        acc_e = acc_e + jnp.dot(xe, w_k, preferred_element_type=jnp.float32)
        acc_o = acc_o + jnp.dot(xo, w_k, preferred_element_type=jnp.float32)

    # ---- Bias + Swish in f32 (VPU + EUP), then pooled max + single store. --
    b = b_ref[...].astype(jnp.float32)                   # (1, C_out) broadcast
    ze = acc_e + b
    zo = acc_o + b
    ze = ze * jax.nn.sigmoid(ze)
    zo = zo * jax.nn.sigmoid(zo)
    pooled = jnp.maximum(ze, zo).reshape(B_blk, L_out, C_out)
    o_ref[...] = pooled.astype(o_ref.dtype)


# --------------------------------------------------------------------------- #
# VMEM / block-size heuristics
# --------------------------------------------------------------------------- #
def _round_up(n, m):
    return -(-n // m) * m


def _tile_bytes(shape, dtype):
    """Bytes for one VMEM buffer including (sublane, 128-lane) tile padding."""
    it = jnp.dtype(dtype).itemsize
    sublane = {4: 8, 2: 16, 1: 32}.get(it, 8)
    dims = [max(int(d), 1) for d in shape]
    dims[-1] = _round_up(dims[-1], 128)
    if len(dims) >= 2:
        dims[-2] = _round_up(dims[-2], sublane)
    n = 1
    for d in dims:
        n *= d
    return n * it


def _vmem_budget():
    """(per-step working-set budget, compiler vmem limit) in bytes."""
    phys = 64 * 1024 * 1024                  # conservative fallback (v7x)
    try:
        cap = int(getattr(pltpu.get_tpu_info(), "vmem_capacity_bytes", 0))
        if cap > 0:
            phys = cap
    except Exception:
        pass
    # v7x (64 MiB phys) -> ~24 MiB per step; v5e/v6e (128 MiB) -> ~48 MiB.
    block_budget = min(48 << 20, max(8 << 20, (phys * 3) // 8))
    vmem_limit = int(min(phys - (8 << 20), block_budget + (16 << 20)))
    vmem_limit = max(vmem_limit, 32 << 20)
    return block_budget, vmem_limit


def _pick_batch_block(B, block_bytes_fn, block_budget, io_bytes_per_row):
    # Largest power-of-two block that fits the per-step VMEM budget.
    cap = 1
    while cap * 2 <= B and block_bytes_fn(cap * 2) <= block_budget:
        cap *= 2
    # Aim for ~8 grid steps (>=2 per TensorCore on v7x so the BlockSpec
    # software pipeline has DMAs to overlap with compute) ...
    steps_target = 8 if B >= 8 else max(1, B)
    bb = max(1, B // steps_target)
    # ... but keep each step above ~0.5 MiB of HBM I/O when that still leaves
    # >= 4 steps for pipelining.
    bb_io = max(1, -(-(512 * 1024) // max(io_bytes_per_row, 1)))
    if bb_io > bb and B // bb_io >= 4:
        bb = bb_io
    return max(1, min(bb, cap, B))


# --------------------------------------------------------------------------- #
# Wrapper
# --------------------------------------------------------------------------- #
def pathcnn_forward(x, weight, bias, *, padding=1, batch_block=None,
                    compute_dtype=None):
    """x: [B, L, C_in]; weight: [C_out, C_in, K] (PyTorch layout); bias: [C_out]."""
    B, L, C_in = x.shape
    C_out, C_in_w, K = weight.shape
    assert C_in_w == C_in, (C_in_w, C_in)
    L_conv = L + 2 * padding - K + 1            # Conv1d output length (stride 1)
    L_out = L_conv // 2                         # MaxPool1d(2), floor semantics
    assert L_conv >= 1 and L_out >= 1, (
        f"empty conv/pool output: L={L}, K={K}, padding={padding}")
    L_pad = L + 2 * padding

    out_dtype = x.dtype
    cdt = jnp.dtype(compute_dtype) if compute_dtype is not None else jnp.dtype(x.dtype)

    # Tiny wrapper-side re-layouts (weights/bias only; x stays untouched in HBM):
    # [C_out, C_in, K] -> tap-major [K, C_in, C_out].
    w_t = jnp.transpose(weight, (2, 1, 0)).astype(cdt)
    b2 = bias.astype(jnp.float32).reshape(1, C_out)

    block_budget, vmem_limit = _vmem_budget()

    if batch_block is None:
        def block_bytes(bb):
            n = 0
            n += 2 * _tile_bytes((bb, L, C_in), x.dtype)             # in (2x pipeline)
            n += 2 * _tile_bytes((bb, L_out, C_out), out_dtype)      # out (2x pipeline)
            n += _tile_bytes((bb, L_pad, C_in), cdt)                 # padded-x scratch
            n += 2 * _tile_bytes((bb * L_out, C_out), jnp.float32)   # even/odd f32 acc
            n += 2 * _tile_bytes((bb * L_out, C_in), cdt)            # dot operands
            n += 2 * _tile_bytes((K, C_in, C_out), cdt)              # weights
            n += 2 * _tile_bytes((1, C_out), jnp.float32)            # bias
            return (n * 5) // 4                                      # 25% headroom

        io_per_row = (L * C_in * jnp.dtype(x.dtype).itemsize
                      + L_out * C_out * jnp.dtype(out_dtype).itemsize)
        batch_block = _pick_batch_block(B, block_bytes, block_budget, io_per_row)

    grid = (-(-B // batch_block),)              # cdiv: partial last block is OK

    kernel = functools.partial(_pathcnn_kernel, padding=padding)

    return pl.pallas_call(
        kernel,
        out_shape=jax.ShapeDtypeStruct((B, L_out, C_out), out_dtype),
        grid_spec=pltpu.PrefetchScalarGridSpec(
            num_scalar_prefetch=0,
            grid=grid,
            in_specs=[
                pl.BlockSpec((batch_block, L, C_in), lambda i: (i, 0, 0)),
                pl.BlockSpec((K, C_in, C_out), lambda i: (0, 0, 0)),
                pl.BlockSpec((1, C_out), lambda i: (0, 0)),
            ],
            out_specs=pl.BlockSpec((batch_block, L_out, C_out),
                                   lambda i: (i, 0, 0)),
            scratch_shapes=[
                pltpu.VMEM((batch_block, L_pad, C_in), cdt),
            ],
        ),
        compiler_params=pltpu.CompilerParams(
            dimension_semantics=("parallel",),
            vmem_limit_bytes=int(vmem_limit),
        ),
    )(x, w_t, b2)


# --------------------------------------------------------------------------- #
# Pure-JAX reference (mirrors the PyTorch module exactly)
# --------------------------------------------------------------------------- #
def _reference_forward(x, weight, bias, *, padding=1):
    xt = jnp.transpose(x, (0, 2, 1))                      # [B, C_in, L]
    y = jax.lax.conv_general_dilated(
        xt, weight, window_strides=(1,), padding=[(padding, padding)],
        dimension_numbers=("NCH", "OIH", "NCH"))
    y = y + bias[None, :, None]
    y = y * jax.nn.sigmoid(y)                             # Swish
    B, C, Lc = y.shape
    y = y[:, :, : (Lc // 2) * 2].reshape(B, C, Lc // 2, 2).max(axis=-1)
    return jnp.transpose(y, (0, 2, 1))                    # [B, Lc//2, C_out]


if __name__ == "__main__":
    key = jax.random.PRNGKey(0)
    k1, k2, k3 = jax.random.split(key, 3)

    batch, seq_len, input_channels = 2, 8, 4
    out_channels, kernel_size, padding = 32, 3, 1

    x = jax.random.normal(k1, (batch, seq_len, input_channels), dtype=jnp.float32)
    # PyTorch Conv1d weight layout: [C_out, C_in, K].
    weight = jax.random.normal(
        k2, (out_channels, input_channels, kernel_size), dtype=jnp.float32) * 0.1
    bias = jax.random.normal(k3, (out_channels,), dtype=jnp.float32) * 0.1

    out = pathcnn_forward(x, weight, bias, padding=padding)
    out = jax.block_until_ready(out)

    ref = _reference_forward(x, weight, bias, padding=padding)
    assert out.shape == (batch, seq_len // 2, out_channels), out.shape
    max_err = float(jnp.max(jnp.abs(out - ref)))
    assert jnp.allclose(out, ref, atol=1e-5, rtol=1e-5), max_err

    print("KERNEL_OK")
</pallas_src>

<mosaic_0001>
module attributes {stable_mosaic.version = 11 : i64} {
  func.func @_pathcnn_kernel(%arg0: i32, %arg1: memref<1x8x4xf32, #tpu.memory_space<vmem>>, %arg2: memref<3x4x32xf32, #tpu.memory_space<vmem>>, %arg3: memref<1x32xf32, #tpu.memory_space<vmem>>, %arg4: memref<1x4x32xf32, #tpu.memory_space<vmem>>, %arg5: memref<1x10x4xf32, #tpu.memory_space<vmem>>) attributes {dimension_semantics = [#tpu.dimension_semantics<parallel>], iteration_bounds = array<i64: 2>, scalar_prefetch = 0 : i64, scratch_operands = 1 : i64, tpu.core_type = #tpu.core_type<tc>, window_params = [{transform_indices = @transform_0, window_bounds = array<i64: 1, 8, 4>}, {pipeline_mode = #tpu.pipeline_mode<synchronous>, transform_indices = @transform_1, window_bounds = array<i64: 3, 4, 32>}, {pipeline_mode = #tpu.pipeline_mode<synchronous>, transform_indices = @transform_2, window_bounds = array<i64: 1, 32>}, {transform_indices = @transform_3, window_bounds = array<i64: 1, 4, 32>}]} {
    %c0 = arith.constant 0 : index
    %c0_0 = arith.constant 0 : index
    %c0_1 = arith.constant 0 : index
    %0 = vector.load %arg1[%c0, %c0_0, %c0_1] : memref<1x8x4xf32, #tpu.memory_space<vmem>>, vector<1x8x4xf32>
    %c0_2 = arith.constant 0 : index
    %c1 = arith.constant 1 : index
    %c0_3 = arith.constant 0 : index
    %1 = vector.load %arg5[%c0_2, %c1, %c0_3] : memref<1x10x4xf32, #tpu.memory_space<vmem>>, vector<1x8x4xf32>
    tpu.vector_store %arg5[%c0_2, %c1, %c0_3], %0 {strides = array<i32>} : memref<1x10x4xf32, #tpu.memory_space<vmem>>, vector<1x8x4xf32>,
    %cst = arith.constant 0.000000e+00 : f32
    %2 = vector.broadcast %cst : f32 to vector<1x1x4xf32>
    %c0_4 = arith.constant 0 : index
    %c0_5 = arith.constant 0 : index
    %c0_6 = arith.constant 0 : index
    %3 = vector.load %arg5[%c0_4, %c0_5, %c0_6] : memref<1x10x4xf32, #tpu.memory_space<vmem>>, vector<1x1x4xf32>
    tpu.vector_store %arg5[%c0_4, %c0_5, %c0_6], %2 {strides = array<i32>} : memref<1x10x4xf32, #tpu.memory_space<vmem>>, vector<1x1x4xf32>,
    %c0_7 = arith.constant 0 : index
    %c9 = arith.constant 9 : index
    %c0_8 = arith.constant 0 : index
    %4 = vector.load %arg5[%c0_7, %c9, %c0_8] : memref<1x10x4xf32, #tpu.memory_space<vmem>>, vector<1x1x4xf32>
    tpu.vector_store %arg5[%c0_7, %c9, %c0_8], %2 {strides = array<i32>} : memref<1x10x4xf32, #tpu.memory_space<vmem>>, vector<1x1x4xf32>,
    %cst_9 = arith.constant 0.000000e+00 : f32
    %5 = vector.broadcast %cst_9 : f32 to vector<4x32xf32>
    %cst_10 = arith.constant 0.000000e+00 : f32
    %6 = vector.broadcast %cst_10 : f32 to vector<4x32xf32>
    %c0_11 = arith.constant 0 : index
    %c0_12 = arith.constant 0 : index
    %c0_13 = arith.constant 0 : index
    %7 = vector.load %arg2[%c0_11, %c0_12, %c0_13] : memref<3x4x32xf32, #tpu.memory_space<vmem>>, vector<1x4x32xf32>
    %8 = vector.shape_cast %7 : vector<1x4x32xf32> to vector<4x32xf32>
    %c0_14 = arith.constant 0 : index
    %c0_15 = arith.constant 0 : index
    %c0_16 = arith.constant 0 : index
    %9 = tpu.strided_load %arg5[%c0_14, %c0_15, %c0_16] {strides = array<i32: 1, 2, 1>} : memref<1x10x4xf32, #tpu.memory_space<vmem>>, vector<1x4x4xf32>
    %10 = vector.shape_cast %9 : vector<1x4x4xf32> to vector<4x4xf32>
    %c0_17 = arith.constant 0 : index
    %c1_18 = arith.constant 1 : index
    %c0_19 = arith.constant 0 : index
    %11 = tpu.strided_load %arg5[%c0_17, %c1_18, %c0_19] {strides = array<i32: 1, 2, 1>} : memref<1x10x4xf32, #tpu.memory_space<vmem>>, vector<1x4x4xf32>
    %12 = vector.shape_cast %11 : vector<1x4x4xf32> to vector<4x4xf32>
    %cst_20 = arith.constant dense<0.000000e+00> : vector<4x32xf32>
    %13 = tpu.matmul %10, %8, %cst_20 {dimension_numbers = #tpu.dot_dimension_numbers<[1], [0], [0], [1], [0, 0, 1, 1], [], []>} : vector<4x4xf32>, vector<4x32xf32>, vector<4x32xf32> -> vector<4x32xf32>
    %14 = arith.addf %5, %13 : vector<4x32xf32>
    %cst_21 = arith.constant dense<0.000000e+00> : vector<4x32xf32>
    %15 = tpu.matmul %12, %8, %cst_21 {dimension_numbers = #tpu.dot_dimension_numbers<[1], [0], [0], [1], [0, 0, 1, 1], [], []>} : vector<4x4xf32>, vector<4x32xf32>, vector<4x32xf32> -> vector<4x32xf32>
    %16 = arith.addf %6, %15 : vector<4x32xf32>
    %c1_22 = arith.constant 1 : index
    %c0_23 = arith.constant 0 : index
    %c0_24 = arith.constant 0 : index
    %17 = vector.load %arg2[%c1_22, %c0_23, %c0_24] : memref<3x4x32xf32, #tpu.memory_space<vmem>>, vector<1x4x32xf32>
    %18 = vector.shape_cast %17 : vector<1x4x32xf32> to vector<4x32xf32>
    %c0_25 = arith.constant 0 : index
    %c1_26 = arith.constant 1 : index
    %c0_27 = arith.constant 0 : index
    %19 = tpu.strided_load %arg5[%c0_25, %c1_26, %c0_27] {strides = array<i32: 1, 2, 1>} : memref<1x10x4xf32, #tpu.memory_space<vmem>>, vector<1x4x4xf32>
    %20 = vector.shape_cast %19 : vector<1x4x4xf32> to vector<4x4xf32>
    %c0_28 = arith.constant 0 : index
    %c2 = arith.constant 2 : index
    %c0_29 = arith.constant 0 : index
    %21 = tpu.strided_load %arg5[%c0_28, %c2, %c0_29] {strides = array<i32: 1, 2, 1>} : memref<1x10x4xf32, #tpu.memory_space<vmem>>, vector<1x4x4xf32>
    %22 = vector.shape_cast %21 : vector<1x4x4xf32> to vector<4x4xf32>
    %cst_30 = arith.constant dense<0.000000e+00> : vector<4x32xf32>
    %23 = tpu.matmul %20, %18, %cst_30 {dimension_numbers = #tpu.dot_dimension_numbers<[1], [0], [0], [1], [0, 0, 1, 1], [], []>} : vector<4x4xf32>, vector<4x32xf32>, vector<4x32xf32> -> vector<4x32xf32>
    %24 = arith.addf %14, %23 : vector<4x32xf32>
    %cst_31 = arith.constant dense<0.000000e+00> : vector<4x32xf32>
    %25 = tpu.matmul %22, %18, %cst_31 {dimension_numbers = #tpu.dot_dimension_numbers<[1], [0], [0], [1], [0, 0, 1, 1], [], []>} : vector<4x4xf32>, vector<4x32xf32>, vector<4x32xf32> -> vector<4x32xf32>
    %26 = arith.addf %16, %25 : vector<4x32xf32>
    %c2_32 = arith.constant 2 : index
    %c0_33 = arith.constant 0 : index
    %c0_34 = arith.constant 0 : index
    %27 = vector.load %arg2[%c2_32, %c0_33, %c0_34] : memref<3x4x32xf32, #tpu.memory_space<vmem>>, vector<1x4x32xf32>
    %28 = vector.shape_cast %27 : vector<1x4x32xf32> to vector<4x32xf32>
    %c0_35 = arith.constant 0 : index
    %c2_36 = arith.constant 2 : index
    %c0_37 = arith.constant 0 : index
    %29 = tpu.strided_load %arg5[%c0_35, %c2_36, %c0_37] {strides = array<i32: 1, 2, 1>} : memref<1x10x4xf32, #tpu.memory_space<vmem>>, vector<1x4x4xf32>
    %30 = vector.shape_cast %29 : vector<1x4x4xf32> to vector<4x4xf32>
    %c0_38 = arith.constant 0 : index
    %c3 = arith.constant 3 : index
    %c0_39 = arith.constant 0 : index
    %31 = tpu.strided_load %arg5[%c0_38, %c3, %c0_39] {strides = array<i32: 1, 2, 1>} : memref<1x10x4xf32, #tpu.memory_space<vmem>>, vector<1x4x4xf32>
    %32 = vector.shape_cast %31 : vector<1x4x4xf32> to vector<4x4xf32>
    %cst_40 = arith.constant dense<0.000000e+00> : vector<4x32xf32>
    %33 = tpu.matmul %30, %28, %cst_40 {dimension_numbers = #tpu.dot_dimension_numbers<[1], [0], [0], [1], [0, 0, 1, 1], [], []>} : vector<4x4xf32>, vector<4x32xf32>, vector<4x32xf32> -> vector<4x32xf32>
    %34 = arith.addf %24, %33 : vector<4x32xf32>
    %cst_41 = arith.constant dense<0.000000e+00> : vector<4x32xf32>
    %35 = tpu.matmul %32, %28, %cst_41 {dimension_numbers = #tpu.dot_dimension_numbers<[1], [0], [0], [1], [0, 0, 1, 1], [], []>} : vector<4x4xf32>, vector<4x32xf32>, vector<4x32xf32> -> vector<4x32xf32>
    %36 = arith.addf %26, %35 : vector<4x32xf32>
    %c0_42 = arith.constant 0 : index
    %c0_43 = arith.constant 0 : index
    %37 = vector.load %arg3[%c0_42, %c0_43] : memref<1x32xf32, #tpu.memory_space<vmem>>, vector<1x32xf32>
    %38 = vector.broadcast %37 : vector<1x32xf32> to vector<4x32xf32>
    %39 = arith.addf %34, %38 : vector<4x32xf32>
    %40 = vector.broadcast %37 : vector<1x32xf32> to vector<4x32xf32>
    %41 = arith.addf %36, %40 : vector<4x32xf32>
    %42 = arith.negf %39 : vector<4x32xf32>
    %43 = math.exp %42 : vector<4x32xf32>
    %cst_44 = arith.constant 1.000000e+00 : f32
    %44 = vector.broadcast %cst_44 : f32 to vector<4x32xf32>
    %45 = arith.addf %44, %43 : vector<4x32xf32>
    %46 = arith.divf %44, %45 : vector<4x32xf32>
    %47 = arith.mulf %39, %46 : vector<4x32xf32>
    %48 = arith.negf %41 : vector<4x32xf32>
    %49 = math.exp %48 : vector<4x32xf32>
    %cst_45 = arith.constant 1.000000e+00 : f32
    %50 = vector.broadcast %cst_45 : f32 to vector<4x32xf32>
    %51 = arith.addf %50, %49 : vector<4x32xf32>
    %52 = arith.divf %50, %51 : vector<4x32xf32>
    %53 = arith.mulf %41, %52 : vector<4x32xf32>
    %54 = arith.maximumf %47, %53 : vector<4x32xf32>
    %55 = vector.shape_cast %54 : vector<4x32xf32> to vector<1x4x32xf32>
    %c0_46 = arith.constant 0 : index
    %c0_47 = arith.constant 0 : index
    %c0_48 = arith.constant 0 : index
    %56 = vector.load %arg4[%c0_46, %c0_47, %c0_48] : memref<1x4x32xf32, #tpu.memory_space<vmem>>, vector<1x4x32xf32>
    tpu.vector_store %arg4[%c0_46, %c0_47, %c0_48], %55 {strides = array<i32>} : memref<1x4x32xf32, #tpu.memory_space<vmem>>, vector<1x4x32xf32>,
    return
  }
  func.func @transform_0(%arg0: i32) -> (i32, i32, i32) {
    %c0_i32 = arith.constant 0 : i32
    %c0_i32_0 = arith.constant 0 : i32
    %c0_i32_1 = arith.constant 0 : i32
    return %arg0, %c0_i32, %c0_i32_0 : i32, i32, i32
  }
  func.func @transform_1(%arg0: i32) -> (i32, i32, i32) {
    %c0_i32 = arith.constant 0 : i32
    %c0_i32_0 = arith.constant 0 : i32
    %c0_i32_1 = arith.constant 0 : i32
    %c0_i32_2 = arith.constant 0 : i32
    return %c0_i32, %c0_i32_0, %c0_i32_1 : i32, i32, i32
  }
  func.func @transform_2(%arg0: i32) -> (i32, i32) {
    %c0_i32 = arith.constant 0 : i32
    %c0_i32_0 = arith.constant 0 : i32
    %c0_i32_1 = arith.constant 0 : i32
    return %c0_i32, %c0_i32_0 : i32, i32
  }
  func.func @transform_3(%arg0: i32) -> (i32, i32, i32) {
    %c0_i32 = arith.constant 0 : i32
    %c0_i32_0 = arith.constant 0 : i32
    %c0_i32_1 = arith.constant 0 : i32
    return %arg0, %c0_i32, %c0_i32_0 : i32, i32, i32
  }
}

</mosaic_0001>

<bundles_post_ra>
// kernel: tpu_custom_call.1
= control target key start
LH: loop header
LB: loop body
LE: loop exit
PB: predicated region body
PF: predicated region fallthrough
CT: control target
= control target key end

     0   :  { %8 = vsyncpa [#allocation4], 0  ;;  %s716_s0 = inlined_call_operand.vmem [shape: f32[2,8,4], index: 0, kind: input, shape index: {}]   ;;  %s717_s1 = inlined_call_operand.vmem [shape: f32[3,4,32], index: 1, kind: input, shape index: {}]   ;;  %s718_s2 = inlined_call_operand.vmem [shape: f32[1,32], index: 2, kind: input, shape index: {}]   ;;  %s719_s3 = inlined_call_operand.hbm [shape: f32[2,4,32], index: 3, kind: output, shape index: {}]  }
   0x1   :  { %10 = vsyncpa [#allocation4 + $0x1], 0  ;;  %s612_s12 = smov 0   ;;  %s614_s13 = smov 0  }
   0x2   :  { %s616_s14 = smov 0   ;;  %s618_s15 = smov 0  }
   0x3 LB: > { %s633_s16 = sadd.s32 4294967295, %s589_s15   ;;  %s452_s17 = sadd.s32 4294967294, %s589_s15   ;;  %s589_s15 = sphi %s618_s15, %s725_s15   ;;  %s585_s14 = sphi %s616_s14, %s724_s14   ;;  %s581_s13 = sphi %s614_s13, %s723_s13   ;;  %s577_s12 = sphi %s612_s12, %s722_s12  }
   0x4   : > { %s637_s18 = sadd.s32 1, %s589_s15   ;;  %s91_s19 = sadd.s32 1, %s585_s14 }
   0x5   : > { %s88_s20 = ssub.s32 %s589_s15, %s637_s18  ;;  %p101_p0 = scmp.ne.s32.totalorder %s585_s14, %s581_s13 }
   0x6   : > { %p89_p1 = scmp.eq.s32.totalorder %s88_s20, 0  ;;  %p102_p2 = scmp.eq.s32.totalorder %s633_s16, 1 }
   0x7   : > { %p107_p3 = scmp.ne.s32.totalorder %s581_s13, %s577_s12  ;;  %p108_p4 = scmp.eq.s32.totalorder %s452_s17, 1 }
   0x8   : > { %s648_s21 = scalar_select %p89_p1, %s585_s14, %s91_s19  }
   0x9   : > { %p650_p5 = por %p102_p2, %p101_p0  ;;  %p654_p6 = por %p108_p4, %p107_p3 }
   0xa   : > { %p455_p7 = scmp.ge.s32.totalorder %s589_s15, 1  ;;  %p139_p8 = scmp.lt.s32.totalorder %s589_s15, 3 }
   0xc   : > { %p140_p9 = pnand %p455_p7, %p139_p8 }
   0xd   : > { %p162_p10 = scmp.lt.s32.totalorder (!%p140_p9), %s633_s16, 1  ;;  %s159_s10 = sand.u32 (!%p140_p9), 1, %s581_s13  }
   0xe   : > { %143 = sbr.rel (%p140_p9) target bundleno = 207 (0xcf), region = 32  ;;  %s680_s11 = sshll.u32 (!%p140_p9), %s159_s10, 2 }
   0xf   : > { %s475_s17 = sshll.u32 (!%p140_p9), %s633_s16, 2  ;;  %s378_s27 = scalar_lea.sflag (!%p140_p9), [#allocation4], %s159_s10 }
  0x10   : > { %s388_s24 = scalar_lea.hbm (!%p140_p9), %s719_s3, %s475_s17  ;;  %s547_s5 = scalar_lea.hbm (!%p140_p9), %s719_s3, 8 }
  0x11   : > { %s392_s26 = sshll.u32 (!%p140_p9), %s388_s24, 4  ;;  %s393_s26 = int_to_ptr.hbm [resolvable:$true] %s392_s26 }
  0x12   : > { %s541_s28 = sshra.s32 (!%p140_p9), %s393_s26, 4  ;;  %s542_s28 = int_to_ptr.hbm [resolvable:$true] %s541_s28 }
  0x13   : > { %v458_v0 = vld [vmem:[%s717_s1 + $0x4] sm:$0xf]  ;;  %vm183_vm0 = vcmask 1043456   ;;  %v172_v1 = vld [vmem:[%s717_s1] sm:$0xf]  ;;  %vm169_vm1 = vcmask 24576   ;;  %p548_p0 = scmp.lt.s32.totalorder %s542_s28, %s719_s3 }
  0x14   : > { %459 = vmatpush.msk.msra.mxu0 %vm183_vm0, %v458_v0  ;;  %461 = vmatpush.msk.msra.mxu1 %vm183_vm0, %v172_v1  ;;  %v467_v2 = vld [vmem:[%s717_s1 + $0x8] sm:$0xf]  ;;  %s163_s30 = scalar_select %p162_p10, %s633_s16, 1  ;;  %v591_v3 = vmov 0.0   ;;  %vm167_vm2 = vcmask 31744   ;;  %vm375_vm11 = vcmask 257024  }
  0x15   : > { %463 = vmatpush.msk.msra.mxu2 %vm183_vm0, %v458_v0  ;;  %465 = vmatpush.msk.msra.mxu3 %vm183_vm0, %v172_v1  ;;  %170 = vst.msk [vmem:[#allocation2] sm:$0x1] %vm169_vm1, %v591_v3  ;;  %v518_v14 = vld [vmem:[%s718_s2] ss:$0 sm:$0xff]  ;;  %s161_s16 = scalar_lea.vmem [#allocation3], %s680_s11  ;;  %s543_s29 = scalar_lea.hbm %s542_s28, 4 }
  0x16   : > { %171 = vst.msk [vmem:[#allocation2 + $0x9] sm:$0x1] %vm169_vm1, %v591_v3  ;;  %468 = vmatpush.msk.msrb.mxu0 %vm183_vm0, %v467_v2  ;;  %470 = vmatpush.msk.msrb.mxu1 %vm183_vm0, %v467_v2  ;;  %s457_s4 = sshll.u32 %s163_s30, 3  ;;  %s390_s25 = sshll.u32 %s161_s16, 4  ;;  %s391_s25 = int_to_ptr.vmem [resolvable:$true] %s390_s25 }
  0x17   : > { %s165_s7 = scalar_lea.vmem %s716_s0, %s457_s4  ;;  %p544_p11 = scmp.ne.s32.totalorder %s542_s28, %s543_s29 }
  0x18   : > { %v166_v4 = vld [vmem:[%s165_s7] sm:$0xff]  ;;  %p549_p1 = scmp.lt.s32.totalorder %s547_s5, %s543_s29 }
  0x19   : > { %168 = vst.msk [vmem:[#allocation2 + $0x1] sm:$0xff] %vm167_vm2, %v166_v4  ;;  %p545_p12 = pnand %p544_p11, %p650_p5 }
  0x1a   : > { %p550_p2 = por %p549_p1, %p548_p0 }
  0x1b   : > { %p546_p13 = pneg %p545_p12 }
  0x1d   : > { %p551_p3 = pnand %p550_p2, %p546_p13 }
  0x20   : > { %v175_v5 = vld [vmem:[#allocation2 + $0x1] ss:$2 sm:$0xf]  ;;  %v173_v6 = vld [vmem:[#allocation2] ss:$2 sm:$0xf] }
  0x21   : > { %460 = vmatmul.msk.f32.vlgmr.msra.gmra.mxu0 %vm167_vm2, %v175_v5  ;;  %462 = vmatmul.msk.f32.vlgmr.msra.gmra.mxu1 %vm167_vm2, %v173_v6  ;;  %v179_v7 = vld [vmem:[#allocation2 + $0x2] ss:$2 sm:$0xf]  ;;  %v279_v8 = vld [vmem:[#allocation2 + $0x3] ss:$2 sm:$0xf] }
  0x22   : > { %464 = vmatmul.msk.f32.vlgmr.msra.gmra.mxu2 %vm167_vm2, %v179_v7  ;;  %466 = vmatmul.msk.f32.vlgmr.msra.gmra.mxu3 %vm167_vm2, %v175_v5 }
  0x29   : > { %469 = vmatmul.msk.f32.vlgmr.msrb.gmra.mxu0 %vm167_vm2, %v179_v7  ;;  %471 = vmatmul.msk.f32.vlgmr.msrb.gmra.mxu1 %vm167_vm2, %v279_v8 }
  0x9e   : > { %v204_v9 = vpop.f32.mrf.mxu0  ;;  %v230_v10 = vpop.f32.mrf.mxu1 }
  0x9f   : > { %v231_v11 = vadd.f32 %v230_v10, %v204_v9 }
  0xa5   : > { %v253_v12 = vpop.f32.mrf.mxu2  ;;  %v273_v13 = vpop.f32.mrf.mxu3 }
  0xa6   : > { %v274_v15 = vadd.f32 %v273_v13, %v253_v12  ;;  %v300_v16 = vpop.f32.mrf.mxu0  ;;  %v324_v17 = vpop.f32.mrf.mxu1 }
  0xa7   : > { %v303_v18 = vadd.f32 %v300_v16, %v231_v11 }
  0xa8   : > { %v327_v19 = vadd.f32 %v324_v17, %v274_v15 }
  0xa9   : > { %v332_v20 = vadd.f32 %v518_v14, %v303_v18 }
  0xaa   : > { %v333_v21 = vadd.f32 %v518_v14, %v327_v19 }
  0xab   : > { %v472_v22 = vmul.f32 -1.442695, %v332_v20 }
  0xac   : > { %v473_v23 = vmul.f32 -1.442695, %v333_v21 }
  0xad   : > { %519 = vpow2.f32 %v472_v22 }
  0xae   : > { %521 = vpow2.f32 %v473_v23 }
  0xb3   : > { %v520_v24 = vpop.eup %519 }
  0xb4   : > { %v522_v25 = vpop.eup %521  ;;  %v337_v26 = vadd.f32 1.0, %v520_v24 }
  0xb5   : > { %v357_v27 = vadd.f32 1.0, %v522_v25 }
  0xb6   : > { %523 = vrcp.f32 %v337_v26  ;;  %v349_v33 = vand.u32 2147483648, %v337_v26  ;;  %v347_v36 = vand.u32 2147483647, %v337_v26  ;;  %vm343_vm5 = vweird.f32 %v337_v26 }
  0xb7   : > { %525 = vrcp.f32 %v357_v27  ;;  %v369_v37 = vand.u32 2147483648, %v357_v27  ;;  %v367_v39 = vand.u32 2147483647, %v357_v27  ;;  %vm363_vm7 = vweird.f32 %v357_v27 }
  0xb8   : > { %v350_v41 = vor.u32 1.1754944e-38, %v349_v33  ;;  %vm348_vm8 = vcmp.eq.f32.partialorder %v347_v36, 8.507059e+37 }
  0xb9   : > { %v370_v44 = vor.u32 1.1754944e-38, %v369_v37  ;;  %vm368_vm10 = vcmp.eq.f32.partialorder %v367_v39, 8.507059e+37 }
  0xbc   : > { %v524_v28 = vpop.eup %523 }
  0xbd   : > { %v526_v29 = vpop.eup %525  ;;  %v339_v30 = vmul.f32 %v524_v28, %v337_v26  ;;  %vm344_vm3 = vweird.f32 %v524_v28 }
  0xbe   : > { %v359_v31 = vmul.f32 %v526_v29, %v357_v27  ;;  %vm364_vm4 = vweird.f32 %v526_v29  ;;  %vm345_vm6 = vmor %vm343_vm5, %vm344_vm3 }
  0xbf   : > { %v340_v32 = vsub.f32 1.0, %v339_v30  ;;  %vm365_vm9 = vmor %vm363_vm7, %vm364_vm4 }
  0xc0   : > { %v360_v34 = vsub.f32 1.0, %v359_v31 }
  0xc1   : > { %v341_v35 = vmul.f32 %v524_v28, %v340_v32 }
  0xc2   : > { %v361_v38 = vmul.f32 %v526_v29, %v360_v34 }
  0xc3   : > { %v342_v40 = vadd.f32 %v524_v28, %v341_v35 }
  0xc4   : > { %v362_v42 = vadd.f32 %v526_v29, %v361_v38 }
  0xc5   : > { %v346_v43 = vsel %vm345_vm6, %v524_v28, %v342_v40 }
  0xc6   : > { %v351_v45 = vsel %vm348_vm8, %v350_v41, %v346_v43  ;;  %v366_v46 = vsel %vm365_vm9, %v526_v29, %v362_v42 }
  0xc7   : > { %v353_v47 = vmul.f32 %v351_v45, %v332_v20  ;;  %v371_v48 = vsel %vm368_vm10, %v370_v44, %v366_v46 }
  0xc8   : > { %v373_v49 = vmul.f32 %v371_v48, %v333_v21 }
  0xca   : > { %v374_v50 = vmax.f32 %v353_v47, %v373_v49 }
  0xcc   : > { %376 = vst.msk [vmem:[%s161_s16] sm:$0xf] %vm375_vm11, %v374_v50 }
  0xcd   : > { %554 = shalt.err (!%p551_p3)
}
  0xce   : > { %478 = dma.vmem_to_hbm [thread:$0]  (%p650_p5), %s391_s25, 64, %s393_s26, %s378_s27  }
  0xcf PF: > { %p484_p4 = scmp.ge.s32.totalorder %s589_s15, 2  ;;  %s404_s8 = sand.u32 1, %s577_s12  }
  0xd0   : > { %s405_s9 = scalar_lea.sflag [#allocation4], %s404_s8 }
  0xd1   : > { %p481_p7 = pnand %p484_p4, %p654_p6 }
  0xd3   : > { %p482_p8 = pneg %p481_p7 }
  0xd5   : > { %572 = dma.done.wait (%p482_p8), %s405_s9, 64  }
  0xd6   : > { %574 = vsyncadd (%p482_p8), %s405_s9, 4294967232  ;;  %p13_p9 = scmp.ge.s32.totalorder %s637_s18, 4   ;;  %s722_s12 = smov %s581_s13 }
  0xd7   : > { %s723_s13 = smov %s585_s14  ;;  %s724_s14 = smov %s648_s21 }
  0xd8   : > { %s725_s15 = smov %s637_s18  ;;  %15 = sbr.rel (!%p13_p9) target bundleno = 3 (0x3), region = 72 }
  0xdd   :  { %411 = vsyncpa [#allocation4], 1 }
  0xde   :  { %413 = vsyncpa [#allocation4 + $0x1], 1 }

</bundles_post_ra>
